<compile_context>
chip_gen: v5e
topology: v5e:2x2
jax: 0.10.0
libtpu: 0.0.40
codegen_flags: <defaults>
</compile_context>

<pallas_src>
import jax
import jax.numpy as jnp
from jax.experimental import pallas as pl
from jax.experimental.pallas import tpu as pltpu

LN_EPS = 1e-5
LEAKY_SLOPE = 0.1
L1_PENALTY = 0.001


def _round_up(x, m):
    return ((x + m - 1) // m) * m


def _single_buffer_supported():
    """True if pl.BlockSpec accepts pipeline_mode=pl.Buffered(1)."""
    if not hasattr(pl, "Buffered"):
        return False
    try:
        pl.BlockSpec((8, 128), lambda i: (0, 0), pipeline_mode=pl.Buffered(1))
        return True
    except Exception:
        return False


def _resident_spec(shape, single_buffer):
    """Constant-index (VMEM-resident) BlockSpec for a 2-D parameter."""
    if single_buffer:
        return pl.BlockSpec(shape, lambda i: (0, 0), pipeline_mode=pl.Buffered(1))
    return pl.BlockSpec(shape, lambda i: (0, 0))


def sae_kernel(x_ref, g_ref, beta_ref,
               w1_ref, b1_ref, w2_ref, b2_ref,
               w3_ref, b3_ref, w4_ref, b4_ref,
               dec_ref, pen_ref):
    x = x_ref[...]                                            # [TB, D] f32

    # ---- LayerNorm over last dim (biased variance, like nn.LayerNorm), f32 ----
    mean = jnp.mean(x, axis=-1, keepdims=True)
    var = jnp.mean(jnp.square(x - mean), axis=-1, keepdims=True)
    xn = (x - mean) * jax.lax.rsqrt(var + LN_EPS)
    xn = xn * g_ref[...] + beta_ref[...]                      # [TB, D]

    wdt = w1_ref.dtype   # weight storage dtype (f32 or bf16); MXU accumulates f32

    # ---- Encoder: Linear(D,3D) -> LeakyReLU(0.1) -> Linear(3D,6D) ----
    h1 = jnp.dot(xn.astype(wdt), w1_ref[...],
                 preferred_element_type=jnp.float32) + b1_ref[...]
    h1 = jnp.where(h1 > 0, h1, LEAKY_SLOPE * h1)
    enc = jnp.dot(h1.astype(wdt), w2_ref[...],
                  preferred_element_type=jnp.float32) + b2_ref[...]

    # ---- Per-row L1 partials emitted early (VPU/XLU overlaps decoder MXU) ----
    pen_ref[...] = jnp.sum(jnp.abs(enc), axis=-1, keepdims=True)   # [TB, 1]

    # ---- Decoder: Linear(6D,3D) -> LeakyReLU(0.1) -> Linear(3D,Dp) ----
    h2 = jnp.dot(enc.astype(wdt), w3_ref[...],
                 preferred_element_type=jnp.float32) + b3_ref[...]
    h2 = jnp.where(h2 > 0, h2, LEAKY_SLOPE * h2)
    dec_ref[...] = jnp.dot(h2.astype(wdt), w4_ref[...],
                           preferred_element_type=jnp.float32) + b4_ref[...]


def robust_sparse_autoencoder(x, params, *, weight_dtype=jnp.float32,
                              batch_tile=None):
    """x: [B, D] float32. params: dict of [in, out]-layout weights (see init_params)."""
    B, D = x.shape
    Dp = _round_up(D, 128)                      # lane-dense decoded output width

    # Batch tile: MXU-friendly and D-aware.
    if batch_tile is not None:
        TB = batch_tile
    elif B < 128:
        TB = _round_up(B, 8)
    elif D <= 128:
        TB = min(512, _round_up(B, 128))        # small D: fewer, bigger grid steps
    elif B >= 512:
        TB = 256
    else:
        TB = 128
    B_pad = _round_up(B, TB)
    grid = (B_pad // TB,)

    xp = x if B_pad == B else jnp.pad(x, ((0, B_pad - B), (0, 0)))

    # Weights in weight_dtype (bf16 halves residency/BW on v6e/v7x); biases and
    # LN params stay f32 so every elementwise op runs on the f32 VPU path.
    w1 = params["w1"].astype(weight_dtype)
    w2 = params["w2"].astype(weight_dtype)
    w3 = params["w3"].astype(weight_dtype)
    w4, b4 = params["w4"], params["b4"]
    if Dp != D:
        # Zero-pad the last layer so stored output is a multiple of 128 lanes
        # (unmasked vst); padded columns are exactly zero and sliced off below.
        w4 = jnp.pad(w4, ((0, 0), (0, Dp - D)))
        b4 = jnp.pad(b4, ((0, 0), (0, Dp - D)))
    w4 = w4.astype(weight_dtype)

    resident_ops = (
        params["ln_gamma"], params["ln_beta"],
        w1, params["b1"], w2, params["b2"], w3, params["b3"], w4, b4,
    )

    # ---- scoped-VMEM budget, clamped to physical per-core VMEM --------------
    resident_bytes = sum(int(a.size) * a.dtype.itemsize for a in resident_ops)
    tile_bytes = 4 * TB * (D + Dp + 1)          # x / dec / pen tiles (double-buffered)
    act_bytes = 4 * TB * 16 * D                 # xn/h1/enc/h2 + cast copies, single copy
    try:
        phys_vmem = int(pltpu.get_tpu_info().vmem_capacity_bytes)
    except Exception:
        phys_vmem = 64 << 20                    # conservative v7x per-core default
    # NOTE: "parallel" batch axis duplicates resident weights per TensorCore,
    # so this budget is per core, not per chip.

    single_buffer_ok = _single_buffer_supported()

    def run(single_buffer_weights):
        weight_buffers = 1 if single_buffer_weights else 2
        need = (weight_buffers * resident_bytes + 2 * tile_bytes
                + act_bytes + (4 << 20))
        vmem_limit = int(min(max(need, 32 << 20), phys_vmem - (8 << 20)))
        vmem_limit = max(vmem_limit, 16 << 20)

        in_specs = [pl.BlockSpec((TB, D), lambda i: (i, 0))]
        in_specs += [_resident_spec(a.shape, single_buffer_weights)
                     for a in resident_ops]
        out_specs = (
            pl.BlockSpec((TB, Dp), lambda i: (i, 0)),   # decoded tile (lane-dense)
            pl.BlockSpec((TB, 1), lambda i: (i, 0)),    # per-row L1 partials
        )
        return pl.pallas_call(
            sae_kernel,
            grid=grid,
            in_specs=in_specs,
            out_specs=out_specs,
            out_shape=(
                jax.ShapeDtypeStruct((B_pad, Dp), jnp.float32),
                jax.ShapeDtypeStruct((B_pad, 1), jnp.float32),
            ),
            compiler_params=pltpu.CompilerParams(
                dimension_semantics=("parallel",),
                vmem_limit_bytes=vmem_limit,
            ),
        )(xp, *resident_ops)

    # TODO(synk): for D beyond the resident budget (large D on v7x's 64 MiB/TC),
    # stream w2/w3 from HBM (memory_space=pl.ANY) with an inner
    # pltpu.emit_pipeline over the 6*D dimension instead of keeping them resident.
    if single_buffer_ok:
        try:
            decoded_p, pen_rows = run(True)
        except Exception:
            decoded_p, pen_rows = run(False)    # fallback if Buffered(1) can't lower
    else:
        decoded_p, pen_rows = run(False)

    decoded = decoded_p[:B, :D]
    # torch.norm(encoded, p=1) * l1_penalty / B  -- global B; padded rows excluded.
    penalty = jnp.sum(pen_rows[:B, 0]) * (L1_PENALTY / B)
    return decoded, penalty


def init_params(key, input_dim):
    """Deterministic init matching the PyTorch module's shapes.
    PyTorch Linear weight is [out, in]; we store the transpose [in, out]."""
    d = input_dim
    dims = [(d, 3 * d), (3 * d, 6 * d), (6 * d, 3 * d), (3 * d, d)]
    params = {
        "ln_gamma": jnp.ones((1, d), jnp.float32),
        "ln_beta": jnp.zeros((1, d), jnp.float32),
    }
    for i, (fan_in, fan_out) in enumerate(dims, start=1):
        key, kw, kb = jax.random.split(key, 3)
        bound = 1.0 / (fan_in ** 0.5)
        params[f"w{i}"] = jax.random.uniform(
            kw, (fan_in, fan_out), jnp.float32, -bound, bound)
        params[f"b{i}"] = jax.random.uniform(
            kb, (1, fan_out), jnp.float32, -bound, bound)
    return params


def reference_forward(x, params):
    """Pure-JAX reference mirroring the PyTorch semantics."""
    mean = jnp.mean(x, axis=-1, keepdims=True)
    var = jnp.mean((x - mean) ** 2, axis=-1, keepdims=True)
    xn = (x - mean) / jnp.sqrt(var + LN_EPS)
    xn = xn * params["ln_gamma"] + params["ln_beta"]
    h1 = xn @ params["w1"] + params["b1"]
    h1 = jnp.where(h1 > 0, h1, LEAKY_SLOPE * h1)
    enc = h1 @ params["w2"] + params["b2"]
    h2 = enc @ params["w3"] + params["b3"]
    h2 = jnp.where(h2 > 0, h2, LEAKY_SLOPE * h2)
    dec = h2 @ params["w4"] + params["b4"]
    pen = jnp.sum(jnp.abs(enc)) * L1_PENALTY / x.shape[0]
    return dec, pen


if __name__ == "__main__":
    key = jax.random.PRNGKey(0)
    B, D = 8, 32  # small shapes: batch=8, input_dim=32 (hidden 96 / 192)

    key, kx, kp = jax.random.split(key, 3)
    x = jax.random.normal(kx, (B, D), jnp.float32)
    params = init_params(kp, D)

    ref_dec, ref_pen = reference_forward(x, params)

    # f32 weight storage: closest parity with the PyTorch module.
    dec32, pen32 = jax.block_until_ready(robust_sparse_autoencoder(x, params))
    assert dec32.shape == (B, D)
    assert jnp.allclose(dec32, ref_dec, atol=2e-3, rtol=2e-3)
    assert jnp.allclose(pen32, ref_pen, atol=1e-4, rtol=2e-3)

    # bf16 weight storage (recommended on v6e/v7x): loose sanity check only.
    dec16, pen16 = jax.block_until_ready(
        robust_sparse_autoencoder(x, params, weight_dtype=jnp.bfloat16))
    assert dec16.shape == (B, D)
    assert jnp.allclose(dec16, ref_dec, atol=5e-2, rtol=5e-2)
    assert jnp.allclose(pen16, ref_pen, atol=5e-2, rtol=5e-2)

    print("KERNEL_OK")
</pallas_src>

<mosaic_0001>
module attributes {stable_mosaic.version = 11 : i64} {
  func.func @sae_kernel(%arg0: i32, %arg1: memref<8x32xf32, #tpu.memory_space<vmem>>, %arg2: memref<1x32xf32, #tpu.memory_space<vmem>>, %arg3: memref<1x32xf32, #tpu.memory_space<vmem>>, %arg4: memref<32x96xf32, #tpu.memory_space<vmem>>, %arg5: memref<1x96xf32, #tpu.memory_space<vmem>>, %arg6: memref<96x192xf32, #tpu.memory_space<vmem>>, %arg7: memref<1x192xf32, #tpu.memory_space<vmem>>, %arg8: memref<192x96xf32, #tpu.memory_space<vmem>>, %arg9: memref<1x96xf32, #tpu.memory_space<vmem>>, %arg10: memref<96x128xf32, #tpu.memory_space<vmem>>, %arg11: memref<1x128xf32, #tpu.memory_space<vmem>>, %arg12: memref<8x128xf32, #tpu.memory_space<vmem>>, %arg13: memref<8x1xf32, #tpu.memory_space<vmem>>) attributes {dimension_semantics = [#tpu.dimension_semantics<parallel>], iteration_bounds = array<i64: 1>, scalar_prefetch = 0 : i64, scratch_operands = 0 : i64, tpu.core_type = #tpu.core_type<tc>, window_params = [{transform_indices = @transform_0, window_bounds = array<i64: 8, 32>}, {pipeline_mode = #tpu.pipeline_mode<synchronous>, transform_indices = @transform_1, window_bounds = array<i64: 1, 32>}, {pipeline_mode = #tpu.pipeline_mode<synchronous>, transform_indices = @transform_2, window_bounds = array<i64: 1, 32>}, {pipeline_mode = #tpu.pipeline_mode<synchronous>, transform_indices = @transform_3, window_bounds = array<i64: 32, 96>}, {pipeline_mode = #tpu.pipeline_mode<synchronous>, transform_indices = @transform_4, window_bounds = array<i64: 1, 96>}, {pipeline_mode = #tpu.pipeline_mode<synchronous>, transform_indices = @transform_5, window_bounds = array<i64: 96, 192>}, {pipeline_mode = #tpu.pipeline_mode<synchronous>, transform_indices = @transform_6, window_bounds = array<i64: 1, 192>}, {pipeline_mode = #tpu.pipeline_mode<synchronous>, transform_indices = @transform_7, window_bounds = array<i64: 192, 96>}, {pipeline_mode = #tpu.pipeline_mode<synchronous>, transform_indices = @transform_8, window_bounds = array<i64: 1, 96>}, {pipeline_mode = #tpu.pipeline_mode<synchronous>, transform_indices = @transform_9, window_bounds = array<i64: 96, 128>}, {pipeline_mode = #tpu.pipeline_mode<synchronous>, transform_indices = @transform_10, window_bounds = array<i64: 1, 128>}, {transform_indices = @transform_11, window_bounds = array<i64: 8, 128>}, {transform_indices = @transform_12, window_bounds = array<i64: 8, 1>}]} {
    %c0 = arith.constant 0 : index
    %c0_0 = arith.constant 0 : index
    %0 = vector.load %arg1[%c0, %c0_0] : memref<8x32xf32, #tpu.memory_space<vmem>>, vector<8x32xf32>
    %cst = arith.constant dense<0.000000e+00> : vector<8xf32>
    %1 = vector.multi_reduction <add>, %0, %cst [1] : vector<8x32xf32> to vector<8xf32>
    %2 = vector.shape_cast %1 : vector<8xf32> to vector<8x1xf32>
    %cst_1 = arith.constant 3.200000e+01 : f32
    %3 = vector.broadcast %cst_1 : f32 to vector<8x1xf32>
    %4 = arith.divf %2, %3 : vector<8x1xf32>
    %5 = vector.broadcast %4 : vector<8x1xf32> to vector<8x32xf32>
    %6 = arith.subf %0, %5 : vector<8x32xf32>
    %7 = arith.mulf %6, %6 : vector<8x32xf32>
    %cst_2 = arith.constant dense<0.000000e+00> : vector<8xf32>
    %8 = vector.multi_reduction <add>, %7, %cst_2 [1] : vector<8x32xf32> to vector<8xf32>
    %9 = vector.shape_cast %8 : vector<8xf32> to vector<8x1xf32>
    %cst_3 = arith.constant 3.200000e+01 : f32
    %10 = vector.broadcast %cst_3 : f32 to vector<8x1xf32>
    %11 = arith.divf %9, %10 : vector<8x1xf32>
    %12 = vector.broadcast %4 : vector<8x1xf32> to vector<8x32xf32>
    %13 = arith.subf %0, %12 : vector<8x32xf32>
    %cst_4 = arith.constant 9.99999974E-6 : f32
    %14 = vector.broadcast %cst_4 : f32 to vector<8x1xf32>
    %15 = arith.addf %11, %14 : vector<8x1xf32>
    %16 = math.rsqrt %15 : vector<8x1xf32>
    %17 = vector.broadcast %16 : vector<8x1xf32> to vector<8x32xf32>
    %18 = arith.mulf %13, %17 : vector<8x32xf32>
    %c0_5 = arith.constant 0 : index
    %c0_6 = arith.constant 0 : index
    %19 = vector.load %arg2[%c0_5, %c0_6] : memref<1x32xf32, #tpu.memory_space<vmem>>, vector<1x32xf32>
    %20 = vector.broadcast %19 : vector<1x32xf32> to vector<8x32xf32>
    %21 = arith.mulf %18, %20 : vector<8x32xf32>
    %c0_7 = arith.constant 0 : index
    %c0_8 = arith.constant 0 : index
    %22 = vector.load %arg3[%c0_7, %c0_8] : memref<1x32xf32, #tpu.memory_space<vmem>>, vector<1x32xf32>
    %23 = vector.broadcast %22 : vector<1x32xf32> to vector<8x32xf32>
    %24 = arith.addf %21, %23 : vector<8x32xf32>
    %c0_9 = arith.constant 0 : index
    %c0_10 = arith.constant 0 : index
    %25 = vector.load %arg4[%c0_9, %c0_10] : memref<32x96xf32, #tpu.memory_space<vmem>>, vector<32x96xf32>
    %cst_11 = arith.constant dense<0.000000e+00> : vector<8x96xf32>
    %26 = tpu.matmul %24, %25, %cst_11 {dimension_numbers = #tpu.dot_dimension_numbers<[1], [0], [0], [1], [0, 0, 1, 1], [], []>} : vector<8x32xf32>, vector<32x96xf32>, vector<8x96xf32> -> vector<8x96xf32>
    %c0_12 = arith.constant 0 : index
    %c0_13 = arith.constant 0 : index
    %27 = vector.load %arg5[%c0_12, %c0_13] : memref<1x96xf32, #tpu.memory_space<vmem>>, vector<1x96xf32>
    %28 = vector.broadcast %27 : vector<1x96xf32> to vector<8x96xf32>
    %29 = arith.addf %26, %28 : vector<8x96xf32>
    %cst_14 = arith.constant 0.000000e+00 : f32
    %30 = vector.broadcast %cst_14 : f32 to vector<8x96xf32>
    %31 = arith.cmpf ogt, %29, %30 : vector<8x96xf32>
    %cst_15 = arith.constant 1.000000e-01 : f32
    %32 = vector.broadcast %cst_15 : f32 to vector<8x96xf32>
    %33 = arith.mulf %32, %29 : vector<8x96xf32>
    %34 = arith.select %31, %29, %33 : vector<8x96xi1>, vector<8x96xf32>
    %c0_16 = arith.constant 0 : index
    %c0_17 = arith.constant 0 : index
    %35 = vector.load %arg6[%c0_16, %c0_17] : memref<96x192xf32, #tpu.memory_space<vmem>>, vector<96x192xf32>
    %cst_18 = arith.constant dense<0.000000e+00> : vector<8x192xf32>
    %36 = tpu.matmul %34, %35, %cst_18 {dimension_numbers = #tpu.dot_dimension_numbers<[1], [0], [0], [1], [0, 0, 1, 1], [], []>} : vector<8x96xf32>, vector<96x192xf32>, vector<8x192xf32> -> vector<8x192xf32>
    %c0_19 = arith.constant 0 : index
    %c0_20 = arith.constant 0 : index
    %37 = vector.load %arg7[%c0_19, %c0_20] : memref<1x192xf32, #tpu.memory_space<vmem>>, vector<1x192xf32>
    %38 = vector.broadcast %37 : vector<1x192xf32> to vector<8x192xf32>
    %39 = arith.addf %36, %38 : vector<8x192xf32>
    %40 = math.absf %39 : vector<8x192xf32>
    %cst_21 = arith.constant dense<0.000000e+00> : vector<8xf32>
    %41 = vector.multi_reduction <add>, %40, %cst_21 [1] : vector<8x192xf32> to vector<8xf32>
    %42 = vector.shape_cast %41 : vector<8xf32> to vector<8x1xf32>
    %c0_22 = arith.constant 0 : index
    %c0_23 = arith.constant 0 : index
    %43 = vector.load %arg13[%c0_22, %c0_23] : memref<8x1xf32, #tpu.memory_space<vmem>>, vector<8x1xf32>
    tpu.vector_store %arg13[%c0_22, %c0_23], %42 {strides = array<i32>} : memref<8x1xf32, #tpu.memory_space<vmem>>, vector<8x1xf32>,
    %c0_24 = arith.constant 0 : index
    %c0_25 = arith.constant 0 : index
    %44 = vector.load %arg8[%c0_24, %c0_25] : memref<192x96xf32, #tpu.memory_space<vmem>>, vector<192x96xf32>
    %cst_26 = arith.constant dense<0.000000e+00> : vector<8x96xf32>
    %45 = tpu.matmul %39, %44, %cst_26 {dimension_numbers = #tpu.dot_dimension_numbers<[1], [0], [0], [1], [0, 0, 1, 1], [], []>} : vector<8x192xf32>, vector<192x96xf32>, vector<8x96xf32> -> vector<8x96xf32>
    %c0_27 = arith.constant 0 : index
    %c0_28 = arith.constant 0 : index
    %46 = vector.load %arg9[%c0_27, %c0_28] : memref<1x96xf32, #tpu.memory_space<vmem>>, vector<1x96xf32>
    %47 = vector.broadcast %46 : vector<1x96xf32> to vector<8x96xf32>
    %48 = arith.addf %45, %47 : vector<8x96xf32>
    %cst_29 = arith.constant 0.000000e+00 : f32
    %49 = vector.broadcast %cst_29 : f32 to vector<8x96xf32>
    %50 = arith.cmpf ogt, %48, %49 : vector<8x96xf32>
    %cst_30 = arith.constant 1.000000e-01 : f32
    %51 = vector.broadcast %cst_30 : f32 to vector<8x96xf32>
    %52 = arith.mulf %51, %48 : vector<8x96xf32>
    %53 = arith.select %50, %48, %52 : vector<8x96xi1>, vector<8x96xf32>
    %c0_31 = arith.constant 0 : index
    %c0_32 = arith.constant 0 : index
    %54 = vector.load %arg10[%c0_31, %c0_32] : memref<96x128xf32, #tpu.memory_space<vmem>>, vector<96x128xf32>
    %cst_33 = arith.constant dense<0.000000e+00> : vector<8x128xf32>
    %55 = tpu.matmul %53, %54, %cst_33 {dimension_numbers = #tpu.dot_dimension_numbers<[1], [0], [0], [1], [0, 0, 1, 1], [], []>} : vector<8x96xf32>, vector<96x128xf32>, vector<8x128xf32> -> vector<8x128xf32>
    %c0_34 = arith.constant 0 : index
    %c0_35 = arith.constant 0 : index
    %56 = vector.load %arg11[%c0_34, %c0_35] : memref<1x128xf32, #tpu.memory_space<vmem>>, vector<1x128xf32>
    %57 = vector.broadcast %56 : vector<1x128xf32> to vector<8x128xf32>
    %58 = arith.addf %55, %57 : vector<8x128xf32>
    %c0_36 = arith.constant 0 : index
    %c0_37 = arith.constant 0 : index
    %59 = vector.load %arg12[%c0_36, %c0_37] : memref<8x128xf32, #tpu.memory_space<vmem>>, vector<8x128xf32>
    tpu.vector_store %arg12[%c0_36, %c0_37], %58 {strides = array<i32>} : memref<8x128xf32, #tpu.memory_space<vmem>>, vector<8x128xf32>,
    return
  }
  func.func @transform_0(%arg0: i32) -> (i32, i32) {
    %c0_i32 = arith.constant 0 : i32
    %c0_i32_0 = arith.constant 0 : i32
    return %arg0, %c0_i32 : i32, i32
  }
  func.func @transform_1(%arg0: i32) -> (i32, i32) {
    %c0_i32 = arith.constant 0 : i32
    %c0_i32_0 = arith.constant 0 : i32
    %c0_i32_1 = arith.constant 0 : i32
    return %c0_i32, %c0_i32_0 : i32, i32
  }
  func.func @transform_2(%arg0: i32) -> (i32, i32) {
    %c0_i32 = arith.constant 0 : i32
    %c0_i32_0 = arith.constant 0 : i32
    %c0_i32_1 = arith.constant 0 : i32
    return %c0_i32, %c0_i32_0 : i32, i32
  }
  func.func @transform_3(%arg0: i32) -> (i32, i32) {
    %c0_i32 = arith.constant 0 : i32
    %c0_i32_0 = arith.constant 0 : i32
    %c0_i32_1 = arith.constant 0 : i32
    return %c0_i32, %c0_i32_0 : i32, i32
  }
  func.func @transform_4(%arg0: i32) -> (i32, i32) {
    %c0_i32 = arith.constant 0 : i32
    %c0_i32_0 = arith.constant 0 : i32
    %c0_i32_1 = arith.constant 0 : i32
    return %c0_i32, %c0_i32_0 : i32, i32
  }
  func.func @transform_5(%arg0: i32) -> (i32, i32) {
    %c0_i32 = arith.constant 0 : i32
    %c0_i32_0 = arith.constant 0 : i32
    %c0_i32_1 = arith.constant 0 : i32
    return %c0_i32, %c0_i32_0 : i32, i32
  }
  func.func @transform_6(%arg0: i32) -> (i32, i32) {
    %c0_i32 = arith.constant 0 : i32
    %c0_i32_0 = arith.constant 0 : i32
    %c0_i32_1 = arith.constant 0 : i32
    return %c0_i32, %c0_i32_0 : i32, i32
  }
  func.func @transform_7(%arg0: i32) -> (i32, i32) {
    %c0_i32 = arith.constant 0 : i32
    %c0_i32_0 = arith.constant 0 : i32
    %c0_i32_1 = arith.constant 0 : i32
    return %c0_i32, %c0_i32_0 : i32, i32
  }
  func.func @transform_8(%arg0: i32) -> (i32, i32) {
    %c0_i32 = arith.constant 0 : i32
    %c0_i32_0 = arith.constant 0 : i32
    %c0_i32_1 = arith.constant 0 : i32
    return %c0_i32, %c0_i32_0 : i32, i32
  }
  func.func @transform_9(%arg0: i32) -> (i32, i32) {
    %c0_i32 = arith.constant 0 : i32
    %c0_i32_0 = arith.constant 0 : i32
    %c0_i32_1 = arith.constant 0 : i32
    return %c0_i32, %c0_i32_0 : i32, i32
  }
  func.func @transform_10(%arg0: i32) -> (i32, i32) {
    %c0_i32 = arith.constant 0 : i32
    %c0_i32_0 = arith.constant 0 : i32
    %c0_i32_1 = arith.constant 0 : i32
    return %c0_i32, %c0_i32_0 : i32, i32
  }
  func.func @transform_11(%arg0: i32) -> (i32, i32) {
    %c0_i32 = arith.constant 0 : i32
    %c0_i32_0 = arith.constant 0 : i32
    return %arg0, %c0_i32 : i32, i32
  }
  func.func @transform_12(%arg0: i32) -> (i32, i32) {
    %c0_i32 = arith.constant 0 : i32
    %c0_i32_0 = arith.constant 0 : i32
    return %arg0, %c0_i32 : i32, i32
  }
}

module attributes {stable_mosaic.version = 11 : i64} {
  func.func @sae_kernel(%arg0: i32, %arg1: memref<8x32xf32, #tpu.memory_space<vmem>>, %arg2: memref<1x32xf32, #tpu.memory_space<vmem>>, %arg3: memref<1x32xf32, #tpu.memory_space<vmem>>, %arg4: memref<32x96xf32, #tpu.memory_space<vmem>>, %arg5: memref<1x96xf32, #tpu.memory_space<vmem>>, %arg6: memref<96x192xf32, #tpu.memory_space<vmem>>, %arg7: memref<1x192xf32, #tpu.memory_space<vmem>>, %arg8: memref<192x96xf32, #tpu.memory_space<vmem>>, %arg9: memref<1x96xf32, #tpu.memory_space<vmem>>, %arg10: memref<96x128xf32, #tpu.memory_space<vmem>>, %arg11: memref<1x128xf32, #tpu.memory_space<vmem>>, %arg12: memref<8x128xf32, #tpu.memory_space<vmem>>, %arg13: memref<8x1xf32, #tpu.memory_space<vmem>>) attributes {dimension_semantics = [#tpu.dimension_semantics<parallel>], iteration_bounds = array<i64: 1>, scalar_prefetch = 0 : i64, scratch_operands = 0 : i64, tpu.core_type = #tpu.core_type<tc>, window_params = [{transform_indices = @transform_0, window_bounds = array<i64: 8, 32>}, {pipeline_mode = #tpu.pipeline_mode<synchronous>, transform_indices = @transform_1, window_bounds = array<i64: 1, 32>}, {pipeline_mode = #tpu.pipeline_mode<synchronous>, transform_indices = @transform_2, window_bounds = array<i64: 1, 32>}, {pipeline_mode = #tpu.pipeline_mode<synchronous>, transform_indices = @transform_3, window_bounds = array<i64: 32, 96>}, {pipeline_mode = #tpu.pipeline_mode<synchronous>, transform_indices = @transform_4, window_bounds = array<i64: 1, 96>}, {pipeline_mode = #tpu.pipeline_mode<synchronous>, transform_indices = @transform_5, window_bounds = array<i64: 96, 192>}, {pipeline_mode = #tpu.pipeline_mode<synchronous>, transform_indices = @transform_6, window_bounds = array<i64: 1, 192>}, {pipeline_mode = #tpu.pipeline_mode<synchronous>, transform_indices = @transform_7, window_bounds = array<i64: 192, 96>}, {pipeline_mode = #tpu.pipeline_mode<synchronous>, transform_indices = @transform_8, window_bounds = array<i64: 1, 96>}, {pipeline_mode = #tpu.pipeline_mode<synchronous>, transform_indices = @transform_9, window_bounds = array<i64: 96, 128>}, {pipeline_mode = #tpu.pipeline_mode<synchronous>, transform_indices = @transform_10, window_bounds = array<i64: 1, 128>}, {transform_indices = @transform_11, window_bounds = array<i64: 8, 128>}, {transform_indices = @transform_12, window_bounds = array<i64: 8, 1>}]} {
    %c0 = arith.constant 0 : index
    %c0_0 = arith.constant 0 : index
    %0 = vector.load %arg1[%c0, %c0_0] : memref<8x32xf32, #tpu.memory_space<vmem>>, vector<8x32xf32>
    %cst = arith.constant dense<0.000000e+00> : vector<8xf32>
    %1 = vector.multi_reduction <add>, %0, %cst [1] : vector<8x32xf32> to vector<8xf32>
    %2 = vector.shape_cast %1 : vector<8xf32> to vector<8x1xf32>
    %cst_1 = arith.constant 3.200000e+01 : f32
    %3 = vector.broadcast %cst_1 : f32 to vector<8x1xf32>
    %4 = arith.divf %2, %3 : vector<8x1xf32>
    %5 = vector.broadcast %4 : vector<8x1xf32> to vector<8x32xf32>
    %6 = arith.subf %0, %5 : vector<8x32xf32>
    %7 = arith.mulf %6, %6 : vector<8x32xf32>
    %cst_2 = arith.constant dense<0.000000e+00> : vector<8xf32>
    %8 = vector.multi_reduction <add>, %7, %cst_2 [1] : vector<8x32xf32> to vector<8xf32>
    %9 = vector.shape_cast %8 : vector<8xf32> to vector<8x1xf32>
    %cst_3 = arith.constant 3.200000e+01 : f32
    %10 = vector.broadcast %cst_3 : f32 to vector<8x1xf32>
    %11 = arith.divf %9, %10 : vector<8x1xf32>
    %12 = vector.broadcast %4 : vector<8x1xf32> to vector<8x32xf32>
    %13 = arith.subf %0, %12 : vector<8x32xf32>
    %cst_4 = arith.constant 9.99999974E-6 : f32
    %14 = vector.broadcast %cst_4 : f32 to vector<8x1xf32>
    %15 = arith.addf %11, %14 : vector<8x1xf32>
    %16 = math.rsqrt %15 : vector<8x1xf32>
    %17 = vector.broadcast %16 : vector<8x1xf32> to vector<8x32xf32>
    %18 = arith.mulf %13, %17 : vector<8x32xf32>
    %c0_5 = arith.constant 0 : index
    %c0_6 = arith.constant 0 : index
    %19 = vector.load %arg2[%c0_5, %c0_6] : memref<1x32xf32, #tpu.memory_space<vmem>>, vector<1x32xf32>
    %20 = vector.broadcast %19 : vector<1x32xf32> to vector<8x32xf32>
    %21 = arith.mulf %18, %20 : vector<8x32xf32>
    %c0_7 = arith.constant 0 : index
    %c0_8 = arith.constant 0 : index
    %22 = vector.load %arg3[%c0_7, %c0_8] : memref<1x32xf32, #tpu.memory_space<vmem>>, vector<1x32xf32>
    %23 = vector.broadcast %22 : vector<1x32xf32> to vector<8x32xf32>
    %24 = arith.addf %21, %23 : vector<8x32xf32>
    %c0_9 = arith.constant 0 : index
    %c0_10 = arith.constant 0 : index
    %25 = vector.load %arg4[%c0_9, %c0_10] : memref<32x96xf32, #tpu.memory_space<vmem>>, vector<32x96xf32>
    %cst_11 = arith.constant dense<0.000000e+00> : vector<8x96xf32>
    %26 = tpu.matmul %24, %25, %cst_11 {dimension_numbers = #tpu.dot_dimension_numbers<[1], [0], [0], [1], [0, 0, 1, 1], [], []>} : vector<8x32xf32>, vector<32x96xf32>, vector<8x96xf32> -> vector<8x96xf32>
    %c0_12 = arith.constant 0 : index
    %c0_13 = arith.constant 0 : index
    %27 = vector.load %arg5[%c0_12, %c0_13] : memref<1x96xf32, #tpu.memory_space<vmem>>, vector<1x96xf32>
    %28 = vector.broadcast %27 : vector<1x96xf32> to vector<8x96xf32>
    %29 = arith.addf %26, %28 : vector<8x96xf32>
    %cst_14 = arith.constant 0.000000e+00 : f32
    %30 = vector.broadcast %cst_14 : f32 to vector<8x96xf32>
    %31 = arith.cmpf ogt, %29, %30 : vector<8x96xf32>
    %cst_15 = arith.constant 1.000000e-01 : f32
    %32 = vector.broadcast %cst_15 : f32 to vector<8x96xf32>
    %33 = arith.mulf %32, %29 : vector<8x96xf32>
    %34 = arith.select %31, %29, %33 : vector<8x96xi1>, vector<8x96xf32>
    %c0_16 = arith.constant 0 : index
    %c0_17 = arith.constant 0 : index
    %35 = vector.load %arg6[%c0_16, %c0_17] : memref<96x192xf32, #tpu.memory_space<vmem>>, vector<96x192xf32>
    %cst_18 = arith.constant dense<0.000000e+00> : vector<8x192xf32>
    %36 = tpu.matmul %34, %35, %cst_18 {dimension_numbers = #tpu.dot_dimension_numbers<[1], [0], [0], [1], [0, 0, 1, 1], [], []>} : vector<8x96xf32>, vector<96x192xf32>, vector<8x192xf32> -> vector<8x192xf32>
    %c0_19 = arith.constant 0 : index
    %c0_20 = arith.constant 0 : index
    %37 = vector.load %arg7[%c0_19, %c0_20] : memref<1x192xf32, #tpu.memory_space<vmem>>, vector<1x192xf32>
    %38 = vector.broadcast %37 : vector<1x192xf32> to vector<8x192xf32>
    %39 = arith.addf %36, %38 : vector<8x192xf32>
    %40 = math.absf %39 : vector<8x192xf32>
    %cst_21 = arith.constant dense<0.000000e+00> : vector<8xf32>
    %41 = vector.multi_reduction <add>, %40, %cst_21 [1] : vector<8x192xf32> to vector<8xf32>
    %42 = vector.shape_cast %41 : vector<8xf32> to vector<8x1xf32>
    %c0_22 = arith.constant 0 : index
    %c0_23 = arith.constant 0 : index
    %43 = vector.load %arg13[%c0_22, %c0_23] : memref<8x1xf32, #tpu.memory_space<vmem>>, vector<8x1xf32>
    tpu.vector_store %arg13[%c0_22, %c0_23], %42 {strides = array<i32>} : memref<8x1xf32, #tpu.memory_space<vmem>>, vector<8x1xf32>,
    %c0_24 = arith.constant 0 : index
    %c0_25 = arith.constant 0 : index
    %44 = vector.load %arg8[%c0_24, %c0_25] : memref<192x96xf32, #tpu.memory_space<vmem>>, vector<192x96xf32>
    %cst_26 = arith.constant dense<0.000000e+00> : vector<8x96xf32>
    %45 = tpu.matmul %39, %44, %cst_26 {dimension_numbers = #tpu.dot_dimension_numbers<[1], [0], [0], [1], [0, 0, 1, 1], [], []>} : vector<8x192xf32>, vector<192x96xf32>, vector<8x96xf32> -> vector<8x96xf32>
    %c0_27 = arith.constant 0 : index
    %c0_28 = arith.constant 0 : index
    %46 = vector.load %arg9[%c0_27, %c0_28] : memref<1x96xf32, #tpu.memory_space<vmem>>, vector<1x96xf32>
    %47 = vector.broadcast %46 : vector<1x96xf32> to vector<8x96xf32>
    %48 = arith.addf %45, %47 : vector<8x96xf32>
    %cst_29 = arith.constant 0.000000e+00 : f32
    %49 = vector.broadcast %cst_29 : f32 to vector<8x96xf32>
    %50 = arith.cmpf ogt, %48, %49 : vector<8x96xf32>
    %cst_30 = arith.constant 1.000000e-01 : f32
    %51 = vector.broadcast %cst_30 : f32 to vector<8x96xf32>
    %52 = arith.mulf %51, %48 : vector<8x96xf32>
    %53 = arith.select %50, %48, %52 : vector<8x96xi1>, vector<8x96xf32>
    %c0_31 = arith.constant 0 : index
    %c0_32 = arith.constant 0 : index
    %54 = vector.load %arg10[%c0_31, %c0_32] : memref<96x128xf32, #tpu.memory_space<vmem>>, vector<96x128xf32>
    %cst_33 = arith.constant dense<0.000000e+00> : vector<8x128xf32>
    %55 = tpu.matmul %53, %54, %cst_33 {dimension_numbers = #tpu.dot_dimension_numbers<[1], [0], [0], [1], [0, 0, 1, 1], [], []>} : vector<8x96xf32>, vector<96x128xf32>, vector<8x128xf32> -> vector<8x128xf32>
    %c0_34 = arith.constant 0 : index
    %c0_35 = arith.constant 0 : index
    %56 = vector.load %arg11[%c0_34, %c0_35] : memref<1x128xf32, #tpu.memory_space<vmem>>, vector<1x128xf32>
    %57 = vector.broadcast %56 : vector<1x128xf32> to vector<8x128xf32>
    %58 = arith.addf %55, %57 : vector<8x128xf32>
    %c0_36 = arith.constant 0 : index
    %c0_37 = arith.constant 0 : index
    %59 = vector.load %arg12[%c0_36, %c0_37] : memref<8x128xf32, #tpu.memory_space<vmem>>, vector<8x128xf32>
    tpu.vector_store %arg12[%c0_36, %c0_37], %58 {strides = array<i32>} : memref<8x128xf32, #tpu.memory_space<vmem>>, vector<8x128xf32>,
    return
  }
  func.func @transform_0(%arg0: i32) -> (i32, i32) {
    %c0_i32 = arith.constant 0 : i32
    %c0_i32_0 = arith.constant 0 : i32
    return %arg0, %c0_i32 : i32, i32
  }
  func.func @transform_1(%arg0: i32) -> (i32, i32) {
    %c0_i32 = arith.constant 0 : i32
    %c0_i32_0 = arith.constant 0 : i32
    %c0_i32_1 = arith.constant 0 : i32
    return %c0_i32, %c0_i32_0 : i32, i32
  }
  func.func @transform_2(%arg0: i32) -> (i32, i32) {
    %c0_i32 = arith.constant 0 : i32
    %c0_i32_0 = arith.constant 0 : i32
    %c0_i32_1 = arith.constant 0 : i32
    return %c0_i32, %c0_i32_0 : i32, i32
  }
  func.func @transform_3(%arg0: i32) -> (i32, i32) {
    %c0_i32 = arith.constant 0 : i32
    %c0_i32_0 = arith.constant 0 : i32
    %c0_i32_1 = arith.constant 0 : i32
    return %c0_i32, %c0_i32_0 : i32, i32
  }
  func.func @transform_4(%arg0: i32) -> (i32, i32) {
    %c0_i32 = arith.constant 0 : i32
    %c0_i32_0 = arith.constant 0 : i32
    %c0_i32_1 = arith.constant 0 : i32
    return %c0_i32, %c0_i32_0 : i32, i32
  }
  func.func @transform_5(%arg0: i32) -> (i32, i32) {
    %c0_i32 = arith.constant 0 : i32
    %c0_i32_0 = arith.constant 0 : i32
    %c0_i32_1 = arith.constant 0 : i32
    return %c0_i32, %c0_i32_0 : i32, i32
  }
  func.func @transform_6(%arg0: i32) -> (i32, i32) {
    %c0_i32 = arith.constant 0 : i32
    %c0_i32_0 = arith.constant 0 : i32
    %c0_i32_1 = arith.constant 0 : i32
    return %c0_i32, %c0_i32_0 : i32, i32
  }
  func.func @transform_7(%arg0: i32) -> (i32, i32) {
    %c0_i32 = arith.constant 0 : i32
    %c0_i32_0 = arith.constant 0 : i32
    %c0_i32_1 = arith.constant 0 : i32
    return %c0_i32, %c0_i32_0 : i32, i32
  }
  func.func @transform_8(%arg0: i32) -> (i32, i32) {
    %c0_i32 = arith.constant 0 : i32
    %c0_i32_0 = arith.constant 0 : i32
    %c0_i32_1 = arith.constant 0 : i32
    return %c0_i32, %c0_i32_0 : i32, i32
  }
  func.func @transform_9(%arg0: i32) -> (i32, i32) {
    %c0_i32 = arith.constant 0 : i32
    %c0_i32_0 = arith.constant 0 : i32
    %c0_i32_1 = arith.constant 0 : i32
    return %c0_i32, %c0_i32_0 : i32, i32
  }
  func.func @transform_10(%arg0: i32) -> (i32, i32) {
    %c0_i32 = arith.constant 0 : i32
    %c0_i32_0 = arith.constant 0 : i32
    %c0_i32_1 = arith.constant 0 : i32
    return %c0_i32, %c0_i32_0 : i32, i32
  }
  func.func @transform_11(%arg0: i32) -> (i32, i32) {
    %c0_i32 = arith.constant 0 : i32
    %c0_i32_0 = arith.constant 0 : i32
    return %arg0, %c0_i32 : i32, i32
  }
  func.func @transform_12(%arg0: i32) -> (i32, i32) {
    %c0_i32 = arith.constant 0 : i32
    %c0_i32_0 = arith.constant 0 : i32
    return %arg0, %c0_i32 : i32, i32
  }
}

</mosaic_0001>

<bundles_post_ra>
// kernel: tpu_custom_call.1
= control target key start
LH: loop header
LB: loop body
LE: loop exit
PB: predicated region body
PF: predicated region fallthrough
CT: control target
= control target key end

     0   :  { %18 = vsyncpa [#allocation3], 0  ;;  %s806_s0 = inlined_call_operand.hbm [shape: f32[8,32], index: 0, kind: input, shape index: {}]   ;;  %s807_s1 = inlined_call_operand.hbm [shape: f32[1,32], index: 1, kind: input, shape index: {}]   ;;  %s808_s2 = inlined_call_operand.vmem [shape: f32[1,32], index: 2, kind: input, shape index: {}]   ;;  %s809_s3 = inlined_call_operand.hbm [shape: f32[32,96], index: 3, kind: input, shape index: {}]   ;;  %s810_s4 = inlined_call_operand.hbm [shape: f32[1,96], index: 4, kind: input, shape index: {}]   ;;  %s811_s5 = inlined_call_operand.hbm [shape: f32[96,192], index: 5, kind: input, shape index: {}]   ;;  %s812_s6 = inlined_call_operand.vmem [shape: f32[1,192], index: 6, kind: input, shape index: {}]   ;;  %s813_s7 = inlined_call_operand.hbm [shape: f32[192,96], index: 7, kind: input, shape index: {}]   ;;  %s814_s8 = inlined_call_operand.vmem [shape: f32[1,96], index: 8, kind: input, shape index: {}]   ;;  %s815_s9 = inlined_call_operand.hbm [shape: f32[96,128], index: 9, kind: input, shape index: {}]   ;;  %s816_s10 = inlined_call_operand.vmem [shape: f32[1,128], index: 10, kind: input, shape index: {}]   ;;  %s817_s11 = inlined_call_operand.hbm [shape: f32[8,128], index: 11, kind: output, shape index: {0}]   ;;  %s818_s12 = inlined_call_operand.vmem [shape: f32[8,1], index: 12, kind: output, shape index: {1}]  }
   0x1   :  { %19 = vsyncpa [#allocation6], 0 }
   0x2   :  { %20 = vsyncpa [#allocation9], 0 }
   0x3   :  { %21 = vsyncpa [#allocation12], 0  ;;  %s39_s23 = sshll.u32 %s807_s1, 4  ;;  %s40_s23 = int_to_ptr.hbm [resolvable:$true] %s39_s23 }
   0x4   :  { %22 = vsyncpa [#allocation4], 0  ;;  %s669_s24 = smov [#allocation5]   ;;  %s65_s28 = sshll.u32 %s810_s4, 4  ;;  %s66_s28 = int_to_ptr.hbm [resolvable:$true] %s65_s28 }
   0x5   :  { %s41_s25 = sshll.u32 %s669_s24, 4  ;;  %s670_s29 = smov [#allocation8]   ;;  %s42_s25 = int_to_ptr.vmem [resolvable:$true] %s41_s25 }
   0x6   :  { %44 = dma.hbm_to_vmem [thread:$0]  %s40_s23, 16, %s42_s25, [#allocation6]  }
   0x7   :  { %s67_s30 = sshll.u32 %s670_s29, 4  ;;  %s90_s15 = sshll.u32 %s813_s7, 4  ;;  %s68_s30 = int_to_ptr.vmem [resolvable:$true] %s67_s30  ;;  %s91_s15 = int_to_ptr.hbm [resolvable:$true] %s90_s15 }
   0x8   :  { %70 = dma.hbm_to_vmem [thread:$0]  %s66_s28, 16, %s68_s30, [#allocation9]  }
   0x9   :  { %s671_s1 = smov [#allocation11]   ;;  %s28_s19 = sshll.u32 %s806_s0, 4  ;;  %s29_s19 = int_to_ptr.hbm [resolvable:$true] %s28_s19 }
   0xa   :  { %s92_s16 = sshll.u32 %s671_s1, 4  ;;  %s672_s20 = smov 128   ;;  %s93_s16 = int_to_ptr.vmem [resolvable:$true] %s92_s16 }
   0xb   :  { %s673_s4 = smov 8   ;;  %s674_s21 = smov [#allocation2]  }
   0xc   :  { %98 = dma.hbm_to_vmem [thread:$0]  %s91_s15, 3072, %s93_s16, [#allocation12], %s672_s20, %s672_s20, %s673_s4  }
   0xd   :  { %s30_s22 = sshll.u32 %s674_s21, 4  ;;  %s51_s7 = sshll.u32 %s809_s3, 4  ;;  %s31_s22 = int_to_ptr.vmem [resolvable:$true] %s30_s22  ;;  %s52_s7 = int_to_ptr.hbm [resolvable:$true] %s51_s7 }
   0xe   :  { %33 = dma.hbm_to_vmem [thread:$0]  %s29_s19, 128, %s31_s22, [#allocation3]  }
   0xf   :  { %s75_s0 = sshll.u32 %s811_s5, 4  ;;  %s675_s27 = smov [#allocation7]   ;;  %s76_s0 = int_to_ptr.hbm [resolvable:$true] %s75_s0 }
  0x10   :  { %s53_s28 = sshll.u32 %s675_s27, 4  ;;  %s676_s29 = smov [#allocation10]   ;;  %s54_s28 = int_to_ptr.vmem [resolvable:$true] %s53_s28 }
  0x11   :  { %59 = dma.hbm_to_vmem [thread:$0]  %s52_s7, 512, %s54_s28, [#allocation6], %s672_s20, %s672_s20, %s673_s4  }
  0x12   :  { %s77_s30 = sshll.u32 %s676_s29, 4  ;;  %s677_s13 = smov 256   ;;  %s78_s30 = int_to_ptr.vmem [resolvable:$true] %s77_s30 }
  0x13   :  { %s678_s3 = smov 16   ;;  %s105_s1 = sshll.u32 %s815_s9, 4  ;;  %s106_s1 = int_to_ptr.hbm [resolvable:$true] %s105_s1 }
  0x14   :  { %83 = dma.hbm_to_vmem [thread:$0]  %s76_s0, 3072, %s78_s30, [#allocation9], %s677_s13, %s677_s13, %s678_s3  }
  0x15   :  { %s679_s5 = smov [#allocation13]  }
  0x16   :  { %s107_s16 = sshll.u32 %s679_s5, 4  ;;  %s108_s16 = int_to_ptr.vmem [resolvable:$true] %s107_s16 }
  0x17   :  { %113 = dma.hbm_to_vmem [thread:$0]  %s106_s1, 1536, %s108_s16, [#allocation12], %s672_s20, %s672_s20, %s673_s4  }
  0x18   :  { %659 = dma.done.wait [#allocation3], 128  }
  0x19   :  { %660 = vsyncadd [#allocation3], 4294967168 }
  0x1a   :  { %661 = dma.done.wait [#allocation6], 528  }
  0x1b   :  { %662 = vsyncadd [#allocation6], 4294966768 }
  0x1c   :  { %663 = dma.done.wait [#allocation9], 3088  }
  0x1d   :  { %664 = vsyncadd [#allocation9], 4294964208 }
  0x1e   :  { %665 = dma.done.wait [#allocation12], 4608  }
  0x1f   :  { %666 = vsyncadd [#allocation12], 4294962688  ;;  %vm145_vm0 = vcmask 261120   ;;  %v144_v0 = vld [vmem:[#allocation2] sm:$0xff]  ;;  %v680_v2 = vmov 32.0   ;;  %v186_v16 = vld [vmem:[#allocation7 + $0x8] sm:$0xff] }
  0x20   :  { %v146_v1 = vsel %vm145_vm0, %v144_v0, 0.0  ;;  %463 = vrcp.f32 %v680_v2  ;;  %v188_v14 = vld [vmem:[#allocation7 + $0x18] sm:$0xff]  ;;  %v187_v15 = vld [vmem:[#allocation7 + $0x10] sm:$0xff]  ;;  %v185_v17 = vld [vmem:[#allocation7] sm:$0xff]  ;;  %vm249_vm6 = vcmask 785408   ;;  %vm295_vm7 = vcmask 523264  }
  0x21   :  { %147 = vadd.xlane.f32.xlu0 %v146_v1  ;;  %208 = vmatpush.msra.mxu1 %v188_v14  ;;  %v241_v18 = vld [vmem:[#allocation10 + $0xb0] sm:$0xff]  ;;  %v242_v19 = vld [vmem:[#allocation10 + $0xb8] sm:$0xff]  ;;  %v239_v20 = vld [vmem:[#allocation10 + $0xa0] sm:$0xff]  ;;  %vm300_vm8 = vcmask 7168   ;;  %s681_s23 = smov [#allocation14]   ;;  %s423_s25 = sshll.u32 %s817_s11, 4  ;;  %s424_s25 = int_to_ptr.hbm [resolvable:$true] %s423_s25 }
  0x22   :  { %277 = vmatpush.msra.mxu2 %v242_v19  ;;  %v240_v21 = vld [vmem:[#allocation10 + $0xa8] sm:$0xff]  ;;  %v237_v22 = vld [vmem:[#allocation10 + $0x90] sm:$0xff]  ;;  %v238_v23 = vld [vmem:[#allocation10 + $0x98] sm:$0xff]  ;;  %s421_s24 = sshll.u32 %s681_s23, 4  ;;  %s422_s24 = int_to_ptr.vmem [resolvable:$true] %s421_s24 }
  0x23   :  { %209 = vmatpush.msra.mxu1 %v187_v15  ;;  %v235_v26 = vld [vmem:[#allocation10 + $0x80] sm:$0xff]  ;;  %v236_v27 = vld [vmem:[#allocation10 + $0x88] sm:$0xff]  ;;  %v233_v29 = vld [vmem:[#allocation10 + $0x70] sm:$0xff] }
  0x24   :  { %278 = vmatpush.msra.mxu2 %v240_v21  ;;  %v234_v30 = vld [vmem:[#allocation10 + $0x78] sm:$0xff]  ;;  %v231_v31 = vld [vmem:[#allocation10 + $0x60] sm:$0xff]  ;;  %v232_v32 = vld [vmem:[#allocation10 + $0x68] sm:$0xff] }
  0x25   :  { %210 = vmatpush.msra.mxu1 %v186_v16  ;;  %v229_v33 = vld [vmem:[#allocation10 + $0x50] sm:$0xff]  ;;  %v230_v34 = vld [vmem:[#allocation10 + $0x58] sm:$0xff]  ;;  %v227_v35 = vld [vmem:[#allocation10 + $0x40] sm:$0xff] }
  0x26   :  { %v464_v3 = vpop.eup %463  ;;  %279 = vmatpush.msra.mxu2 %v238_v23  ;;  %v228_v36 = vld [vmem:[#allocation10 + $0x48] sm:$0xff]  ;;  %v225_v38 = vld [vmem:[#allocation10 + $0x30] sm:$0xff]  ;;  %v226_v39 = vld [vmem:[#allocation10 + $0x38] sm:$0xff] }
  0x27   :  { %v150_v4 = vmul.f32 32.0, %v464_v3  ;;  %vm154_vm1 = vweird.f32 %v464_v3  ;;  %211 = vmatpush.msra.mxu1 %v185_v17  ;;  %v458_v45 = vld [vmem:[#allocation5] ss:$0 sm:$0xff]  ;;  %v459_v48 = vld [vmem:[%s808_s2] ss:$0 sm:$0xff]  ;;  %v223_v51 = vld [vmem:[#allocation10 + $0x20] sm:$0xff] }
  0x28   :  { %280 = vmatpush.msra.mxu2 %v236_v27  ;;  %v224_v52 = vld [vmem:[#allocation10 + $0x28] sm:$0xff]  ;;  %v221_v53 = vld [vmem:[#allocation10 + $0x10] sm:$0xff]  ;;  %v222_v54 = vld [vmem:[#allocation10 + $0x18] sm:$0xff] }
  0x29   :  { %v151_v5 = vsub.f32 1.0, %v150_v4  ;;  %257 = vmatpush.msrb.mxu1 %v241_v18  ;;  %v219_v55 = vld [vmem:[#allocation10] sm:$0xff]  ;;  %v220_v56 = vld [vmem:[#allocation10 + $0x8] sm:$0xff]  ;;  %v317_v57 = vld [vmem:[#allocation11 + $0x78] sm:$0xff] }
  0x2a   :  { %281 = vmatpush.msra.mxu2 %v234_v30  ;;  %v316_v58 = vld [vmem:[#allocation11 + $0x70] sm:$0xff]  ;;  %333 = vmatpush.msra.mxu3 %v317_v57  ;;  %v315_v59 = vld [vmem:[#allocation11 + $0x68] sm:$0xff]  ;;  %v314_v60 = vld [vmem:[#allocation11 + $0x60] sm:$0xff] }
  0x2b   :  { %v152_v6 = vmul.f32 %v464_v3, %v151_v5  ;;  %258 = vmatpush.msrb.mxu1 %v239_v20  ;;  %v325_v61 = vld [vmem:[#allocation11 + $0xb8] sm:$0xff]  ;;  %v324_v62 = vld [vmem:[#allocation11 + $0xb0] sm:$0xff]  ;;  %v311_v2 = vld [vmem:[#allocation11 + $0x48] sm:$0xff] }
  0x2c   :  { %282 = vmatpush.msra.mxu2 %v232_v32  ;;  %334 = vmatpush.msra.mxu3 %v316_v58  ;;  %v313_v63 = vld [vmem:[#allocation11 + $0x58] sm:$0xff]  ;;  %v312_v1 = vld [vmem:[#allocation11 + $0x50] sm:$0xff]  ;;  %v303_v15 = vld [vmem:[#allocation11 + $0x8] sm:$0xff] }
  0x2d   :  { %v153_v7 = vadd.f32 %v464_v3, %v152_v6  ;;  %259 = vmatpush.msrb.mxu1 %v237_v22  ;;  %361 = vmatpush.msra.mxu0 %v325_v61  ;;  %v309_v4 = vld [vmem:[#allocation11 + $0x38] sm:$0xff]  ;;  %v308_v5 = vld [vmem:[#allocation11 + $0x30] sm:$0xff]  ;;  %v307_v6 = vld [vmem:[#allocation11 + $0x28] sm:$0xff] }
  0x2e   :  { %283 = vmatpush.msra.mxu2 %v230_v34  ;;  %335 = vmatpush.msra.mxu3 %v315_v59  ;;  %v322_v16 = vld [vmem:[#allocation11 + $0xa0] sm:$0xff]  ;;  %v321_v18 = vld [vmem:[#allocation11 + $0x98] sm:$0xff]  ;;  %v320_v19 = vld [vmem:[#allocation11 + $0x90] sm:$0xff] }
  0x2f   :  { %v155_v8 = vsel %vm154_vm1, %v464_v3, %v153_v7  ;;  %260 = vmatpush.msrb.mxu1 %v235_v26  ;;  %362 = vmatpush.msra.mxu0 %v324_v62  ;;  %v310_v3 = vld [vmem:[#allocation11 + $0x40] sm:$0xff]  ;;  %v319_v20 = vld [vmem:[#allocation11 + $0x88] sm:$0xff]  ;;  %v387_v22 = vld [vmem:[#allocation13 + $0x58] sm:$0xff] }
  0x30   :  { %284 = vmatpush.msra.mxu2 %v228_v36  ;;  %336 = vmatpush.msra.mxu3 %v314_v60  ;;  %v306_v7 = vld [vmem:[#allocation11 + $0x20] sm:$0xff]  ;;  %v386_v23 = vld [vmem:[#allocation13 + $0x50] sm:$0xff]  ;;  %v383_v26 = vld [vmem:[#allocation13 + $0x38] sm:$0xff] }
  0x31   :  { %261 = vmatpush.msrb.mxu1 %v233_v29  ;;  %v302_v17 = vld [vmem:[#allocation11] sm:$0xff]  ;;  %v382_v27 = vld [vmem:[#allocation13 + $0x30] sm:$0xff] }
  0x32   :  { %285 = vmatpush.msra.mxu2 %v226_v39  ;;  %337 = vmatpush.msra.mxu3 %v313_v63  ;;  %v318_v21 = vld [vmem:[#allocation11 + $0x80] sm:$0xff]  ;;  %v381_v39 = vld [vmem:[#allocation13 + $0x28] sm:$0xff] }
  0x33   :  { %262 = vmatpush.msrb.mxu1 %v231_v31 }
  0x34   :  { %286 = vmatpush.msra.mxu2 %v224_v52  ;;  %338 = vmatpush.msra.mxu3 %v312_v1 }
  0x35   :  { %263 = vmatpush.msrb.mxu1 %v229_v33 }
  0x36   :  { %287 = vmatpush.msra.mxu2 %v222_v54  ;;  %339 = vmatpush.msra.mxu3 %v311_v2 }
  0x37   :  { %264 = vmatpush.msrb.mxu1 %v227_v35 }
  0x38   :  { %288 = vmatpush.msra.mxu2 %v220_v56  ;;  %340 = vmatpush.msra.mxu3 %v310_v3 }
  0x39   :  { %265 = vmatpush.msrb.mxu1 %v225_v38 }
  0x3a   :  { %341 = vmatpush.msra.mxu3 %v309_v4 }
  0x3b   :  { %266 = vmatpush.msrb.mxu1 %v223_v51 }
  0x3c   :  { %342 = vmatpush.msra.mxu3 %v308_v5 }
  0x3d   :  { %267 = vmatpush.msrb.mxu1 %v221_v53  ;;  %v462_v53 = vld [vmem:[%s816_s10] ss:$0 sm:$0xff] }
  0x3e   :  { %343 = vmatpush.msra.mxu3 %v307_v6 }
  0x3f   :  { %268 = vmatpush.msrb.mxu1 %v219_v55 }
  0x40   :  { %344 = vmatpush.msra.mxu3 %v306_v7 }
  0x94   :  { %v148_v9 = vpop.xlane.xlu0 %147 }
  0x95   :  { %v156_v10 = vmul.f32 %v155_v8, %v148_v9  ;;  %v460_v9 = vld [vmem:[#allocation8] ss:$0 sm:$0xff] }
  0x97   :  { %v778_v11 = vsub.f32 %v144_v0, %v156_v10  ;;  %v323_v0 = vld [vmem:[#allocation11 + $0xa8] sm:$0xff]  ;;  %v304_v10 = vld [vmem:[#allocation11 + $0x10] sm:$0xff] }
  0x98   :  { %363 = vmatpush.msra.mxu0 %v323_v0 }
  0x99   :  { %v158_v12 = vmul.f32 %v778_v11, %v778_v11 }
  0x9a   :  { %364 = vmatpush.msra.mxu0 %v322_v16 }
  0x9b   :  { %v159_v13 = vsel %vm145_vm0, %v158_v12, 0.0 }
  0x9c   :  { %160 = vadd.xlane.f32.xlu0 %v159_v13  ;;  %365 = vmatpush.msra.mxu0 %v321_v18 }
  0x9e   :  { %366 = vmatpush.msra.mxu0 %v320_v19 }
  0xa0   :  { %367 = vmatpush.msra.mxu0 %v319_v20 }
  0xa2   :  { %368 = vmatpush.msra.mxu0 %v318_v21 }
  0xa4   :  { %399 = vmatpush.msrb.mxu0 %v387_v22 }
  0xa6   :  { %400 = vmatpush.msrb.mxu0 %v386_v23 }
 0x10f   :  { %v161_v24 = vpop.xlane.xlu0 %160 }
 0x110   :  { %v162_v25 = vmul.f32 %v161_v24, %v155_v8  ;;  %v305_v8 = vld [vmem:[#allocation11 + $0x18] sm:$0xff]  ;;  %v385_v24 = vld [vmem:[#allocation13 + $0x48] sm:$0xff] }
 0x111   :  { %345 = vmatpush.msra.mxu3 %v305_v8  ;;  %401 = vmatpush.msrb.mxu0 %v385_v24 }
 0x112   :  { %v163_v28 = vadd.f32 1e-05, %v162_v25  ;;  %v384_v25 = vld [vmem:[#allocation13 + $0x40] sm:$0xff] }
 0x113   :  { %346 = vmatpush.msra.mxu3 %v304_v10  ;;  %402 = vmatpush.msrb.mxu0 %v384_v25 }
 0x114   :  { %465 = vrsqrt.f32 %v163_v28  ;;  %vm170_vm3 = vweird.f32 %v163_v28 }
 0x115   :  { %347 = vmatpush.msra.mxu3 %v303_v15  ;;  %403 = vmatpush.msrb.mxu0 %v383_v26 }
 0x117   :  { %348 = vmatpush.msra.mxu3 %v302_v17  ;;  %404 = vmatpush.msrb.mxu0 %v382_v27 }
 0x119   :  { %405 = vmatpush.msrb.mxu0 %v381_v39 }
 0x11a   :  { %v466_v37 = vpop.eup %465 }
 0x11b   :  { %v165_v40 = vmul.f32 %v466_v37, %v163_v28  ;;  %vm171_vm2 = vweird.f32 %v466_v37  ;;  %v243_v28 = vld [vmem:[%s812_s6] sm:$0x3] }
 0x11c   :  { %vm172_vm4 = vmor %vm170_vm3, %vm171_vm2  ;;  %v245_v29 = vperm.slane %v243_v28, 0  ;;  %v246_v32 = vperm.slane %v243_v28, 1 }
 0x11d   :  { %v166_v41 = vmul.f32 %v466_v37, %v165_v40  ;;  %v380_v40 = vld [vmem:[#allocation13 + $0x20] sm:$0xff] }
 0x11e   :  { %406 = vmatpush.msrb.mxu0 %v380_v40 }
 0x11f   :  { %v167_v42 = vmul.f32 0.5, %v166_v41  ;;  %v379_v41 = vld [vmem:[#allocation13 + $0x18] sm:$0xff] }
 0x120   :  { %407 = vmatpush.msrb.mxu0 %v379_v41 }
 0x121   :  { %v168_v43 = vsub.f32 1.5, %v167_v42  ;;  %v378_v42 = vld [vmem:[#allocation13 + $0x10] sm:$0xff] }
 0x122   :  { %408 = vmatpush.msrb.mxu0 %v378_v42 }
 0x123   :  { %v169_v44 = vmul.f32 %v466_v37, %v168_v43  ;;  %v377_v43 = vld [vmem:[#allocation13 + $0x8] sm:$0xff] }
 0x124   :  { %409 = vmatpush.msrb.mxu0 %v377_v43 }
 0x125   :  { %v173_v46 = vsel %vm172_vm4, %v466_v37, %v169_v44  ;;  %v376_v44 = vld [vmem:[#allocation13] sm:$0xff] }
 0x126   :  { %v174_v47 = vmul.f32 %v173_v46, %v778_v11  ;;  %410 = vmatpush.msrb.mxu0 %v376_v44  ;;  %v461_v46 = vld [vmem:[%s814_s8] ss:$0 sm:$0xff] }
 0x128   :  { %v179_v49 = vmul.f32 %v458_v45, %v174_v47 }
 0x12a   :  { %v184_v50 = vadd.f32 %v459_v48, %v179_v49 }
 0x12c   :  { %440 = vmatmul.msk.f32.vlgmr.msra.gmra.mxu1 %vm145_vm0, %v184_v50 }
 0x1a9   :  { %v213_v11 = vpop.f32.mrf.mxu1 }
 0x1aa   :  { %v214_v12 = vadd.f32 %v460_v9, %v213_v11 }
 0x1ac   :  { %vm216_vm5 = vcmp.gt.f32.partialorder %v214_v12, 0.0  ;;  %v217_v13 = vmul.f32 0.1, %v214_v12 }
 0x1ae   :  { %v218_v14 = vsel %vm216_vm5, %v214_v12, %v217_v13 }
 0x1af   :  { %441 = vmatmul.msk.f32.vlgmr.msrb.gmra.mxu1 %vm249_vm6, %v218_v14  ;;  %442 = vmatmul.msk.f32.vlgmr.msra.gmra.mxu2 %vm249_vm6, %v218_v14 }
 0x22c   :  { %v270_v30 = vpop.f32.mrf.mxu1 }
 0x22d   :  { %v271_v31 = vadd.f32 %v270_v30, %v245_v29 }
 0x22f   :  { %349 = vmatmul.f32.vlgmr.msra.gmra.mxu3 %v271_v31  ;;  %v293_v36 = vand.u32 2147483647, %v271_v31 }
 0x232   :  { %v290_v33 = vpop.f32.mrf.mxu2 }
 0x233   :  { %v291_v34 = vadd.f32 %v290_v33, %v246_v32 }
 0x235   :  { %v294_v35 = vand.u32 2147483647, %v291_v34  ;;  %443 = vmatmul.msk.f32.vlgmr.msra.gmra.mxu0 %vm295_vm7, %v291_v34 }
 0x237   :  { %v296_v37 = vsel %vm295_vm7, %v294_v35, 0.0 }
 0x238   :  { %v297_v38 = vadd.f32 %v296_v37, %v293_v36 }
 0x23a   :  { %298 = vadd.xlane.f32.xlu1 %v297_v38 }
 0x2ad   :  { %v299_v45 = vpop.xlane.xlu1 %298 }
 0x2ae   :  { %301 = vst.msk [vmem:[%s818_s12] sm:$0xff] %vm300_vm8, %v299_v45 }
 0x2b2   :  { %v350_v47 = vpop.f32.mrf.mxu3  ;;  %v370_v49 = vpop.f32.mrf.mxu0 }
 0x2b3   :  { %v351_v48 = vadd.f32 %v461_v46, %v350_v47 }
 0x2b5   :  { %v371_v50 = vadd.f32 %v370_v49, %v351_v48 }
 0x2b7   :  { %vm373_vm9 = vcmp.gt.f32.partialorder %v371_v50, 0.0  ;;  %v374_v51 = vmul.f32 0.1, %v371_v50 }
 0x2b9   :  { %v375_v52 = vsel %vm373_vm9, %v371_v50, %v374_v51 }
 0x2ba   :  { %444 = vmatmul.msk.f32.vlgmr.msrb.gmra.mxu0 %vm249_vm6, %v375_v52 }
 0x337   :  { %v412_v54 = vpop.f32.mrf.mxu0 }
 0x338   :  { %v413_v55 = vadd.f32 %v462_v53, %v412_v54 }
 0x33a   :  { %415 = vst [vmem:[#allocation14] sm:$0xff] %v413_v55 }
 0x33b   :  { %426 = dma.vmem_to_hbm [thread:$0]  %s422_s24, 128, %s424_s25, [#allocation4]  }
 0x33c   :  { %667 = dma.done.wait [#allocation4], 128  }
 0x33d   :  { %668 = vsyncadd [#allocation4], 4294967168 }
 0x33e   :  { %435 = vsyncpa [#allocation3], 1 }
 0x33f   :  { %436 = vsyncpa [#allocation6], 1 }
 0x340   :  { %437 = vsyncpa [#allocation9], 1 }
 0x341   :  { %438 = vsyncpa [#allocation12], 1 }
 0x342   :  { %439 = vsyncpa [#allocation4], 1 }

// kernel: tpu_custom_call.1
= control target key start
LH: loop header
LB: loop body
LE: loop exit
PB: predicated region body
PF: predicated region fallthrough
CT: control target
= control target key end

     0   :  { %18 = vsyncpa [#allocation3], 0  ;;  %s806_s0 = inlined_call_operand.hbm [shape: f32[8,32], index: 0, kind: input, shape index: {}]   ;;  %s807_s1 = inlined_call_operand.hbm [shape: f32[1,32], index: 1, kind: input, shape index: {}]   ;;  %s808_s2 = inlined_call_operand.vmem [shape: f32[1,32], index: 2, kind: input, shape index: {}]   ;;  %s809_s3 = inlined_call_operand.hbm [shape: f32[32,96], index: 3, kind: input, shape index: {}]   ;;  %s810_s4 = inlined_call_operand.hbm [shape: f32[1,96], index: 4, kind: input, shape index: {}]   ;;  %s811_s5 = inlined_call_operand.hbm [shape: f32[96,192], index: 5, kind: input, shape index: {}]   ;;  %s812_s6 = inlined_call_operand.vmem [shape: f32[1,192], index: 6, kind: input, shape index: {}]   ;;  %s813_s7 = inlined_call_operand.hbm [shape: f32[192,96], index: 7, kind: input, shape index: {}]   ;;  %s814_s8 = inlined_call_operand.vmem [shape: f32[1,96], index: 8, kind: input, shape index: {}]   ;;  %s815_s9 = inlined_call_operand.hbm [shape: f32[96,128], index: 9, kind: input, shape index: {}]   ;;  %s816_s10 = inlined_call_operand.vmem [shape: f32[1,128], index: 10, kind: input, shape index: {}]   ;;  %s817_s11 = inlined_call_operand.hbm [shape: f32[8,128], index: 11, kind: output, shape index: {0}]   ;;  %s818_s12 = inlined_call_operand.vmem [shape: f32[8,1], index: 12, kind: output, shape index: {1}]  }
   0x1   :  { %19 = vsyncpa [#allocation6], 0 }
   0x2   :  { %20 = vsyncpa [#allocation9], 0 }
   0x3   :  { %21 = vsyncpa [#allocation12], 0  ;;  %s39_s23 = sshll.u32 %s807_s1, 4  ;;  %s40_s23 = int_to_ptr.hbm [resolvable:$true] %s39_s23 }
   0x4   :  { %22 = vsyncpa [#allocation4], 0  ;;  %s669_s24 = smov [#allocation5]   ;;  %s65_s28 = sshll.u32 %s810_s4, 4  ;;  %s66_s28 = int_to_ptr.hbm [resolvable:$true] %s65_s28 }
   0x5   :  { %s41_s25 = sshll.u32 %s669_s24, 4  ;;  %s670_s29 = smov [#allocation8]   ;;  %s42_s25 = int_to_ptr.vmem [resolvable:$true] %s41_s25 }
   0x6   :  { %44 = dma.hbm_to_vmem [thread:$0]  %s40_s23, 16, %s42_s25, [#allocation6]  }
   0x7   :  { %s67_s30 = sshll.u32 %s670_s29, 4  ;;  %s90_s15 = sshll.u32 %s813_s7, 4  ;;  %s68_s30 = int_to_ptr.vmem [resolvable:$true] %s67_s30  ;;  %s91_s15 = int_to_ptr.hbm [resolvable:$true] %s90_s15 }
   0x8   :  { %70 = dma.hbm_to_vmem [thread:$0]  %s66_s28, 16, %s68_s30, [#allocation9]  }
   0x9   :  { %s671_s1 = smov [#allocation11]   ;;  %s28_s19 = sshll.u32 %s806_s0, 4  ;;  %s29_s19 = int_to_ptr.hbm [resolvable:$true] %s28_s19 }
   0xa   :  { %s92_s16 = sshll.u32 %s671_s1, 4  ;;  %s672_s20 = smov 128   ;;  %s93_s16 = int_to_ptr.vmem [resolvable:$true] %s92_s16 }
   0xb   :  { %s673_s4 = smov 8   ;;  %s674_s21 = smov [#allocation2]  }
   0xc   :  { %98 = dma.hbm_to_vmem [thread:$0]  %s91_s15, 3072, %s93_s16, [#allocation12], %s672_s20, %s672_s20, %s673_s4  }
   0xd   :  { %s30_s22 = sshll.u32 %s674_s21, 4  ;;  %s51_s7 = sshll.u32 %s809_s3, 4  ;;  %s31_s22 = int_to_ptr.vmem [resolvable:$true] %s30_s22  ;;  %s52_s7 = int_to_ptr.hbm [resolvable:$true] %s51_s7 }
   0xe   :  { %33 = dma.hbm_to_vmem [thread:$0]  %s29_s19, 128, %s31_s22, [#allocation3]  }
   0xf   :  { %s75_s0 = sshll.u32 %s811_s5, 4  ;;  %s675_s27 = smov [#allocation7]   ;;  %s76_s0 = int_to_ptr.hbm [resolvable:$true] %s75_s0 }
  0x10   :  { %s53_s28 = sshll.u32 %s675_s27, 4  ;;  %s676_s29 = smov [#allocation10]   ;;  %s54_s28 = int_to_ptr.vmem [resolvable:$true] %s53_s28 }
  0x11   :  { %59 = dma.hbm_to_vmem [thread:$0]  %s52_s7, 512, %s54_s28, [#allocation6], %s672_s20, %s672_s20, %s673_s4  }
  0x12   :  { %s77_s30 = sshll.u32 %s676_s29, 4  ;;  %s677_s13 = smov 256   ;;  %s78_s30 = int_to_ptr.vmem [resolvable:$true] %s77_s30 }
  0x13   :  { %s678_s3 = smov 16   ;;  %s105_s1 = sshll.u32 %s815_s9, 4  ;;  %s106_s1 = int_to_ptr.hbm [resolvable:$true] %s105_s1 }
  0x14   :  { %83 = dma.hbm_to_vmem [thread:$0]  %s76_s0, 3072, %s78_s30, [#allocation9], %s677_s13, %s677_s13, %s678_s3  }
  0x15   :  { %s679_s5 = smov [#allocation13]  }
  0x16   :  { %s107_s16 = sshll.u32 %s679_s5, 4  ;;  %s108_s16 = int_to_ptr.vmem [resolvable:$true] %s107_s16 }
  0x17   :  { %113 = dma.hbm_to_vmem [thread:$0]  %s106_s1, 1536, %s108_s16, [#allocation12], %s672_s20, %s672_s20, %s673_s4  }
  0x18   :  { %659 = dma.done.wait [#allocation3], 128  }
  0x19   :  { %660 = vsyncadd [#allocation3], 4294967168 }
  0x1a   :  { %661 = dma.done.wait [#allocation6], 528  }
  0x1b   :  { %662 = vsyncadd [#allocation6], 4294966768 }
  0x1c   :  { %663 = dma.done.wait [#allocation9], 3088  }
  0x1d   :  { %664 = vsyncadd [#allocation9], 4294964208 }
  0x1e   :  { %665 = dma.done.wait [#allocation12], 4608  }
  0x1f   :  { %666 = vsyncadd [#allocation12], 4294962688  ;;  %vm145_vm0 = vcmask 261120   ;;  %v144_v0 = vld [vmem:[#allocation2] sm:$0xff]  ;;  %v680_v2 = vmov 32.0   ;;  %v186_v16 = vld [vmem:[#allocation7 + $0x8] sm:$0xff] }
  0x20   :  { %v146_v1 = vsel %vm145_vm0, %v144_v0, 0.0  ;;  %463 = vrcp.f32 %v680_v2  ;;  %v188_v14 = vld [vmem:[#allocation7 + $0x18] sm:$0xff]  ;;  %v187_v15 = vld [vmem:[#allocation7 + $0x10] sm:$0xff]  ;;  %v185_v17 = vld [vmem:[#allocation7] sm:$0xff]  ;;  %vm249_vm6 = vcmask 785408   ;;  %vm295_vm7 = vcmask 523264  }
  0x21   :  { %147 = vadd.xlane.f32.xlu0 %v146_v1  ;;  %208 = vmatpush.msra.mxu1 %v188_v14  ;;  %v241_v18 = vld [vmem:[#allocation10 + $0xb0] sm:$0xff]  ;;  %v242_v19 = vld [vmem:[#allocation10 + $0xb8] sm:$0xff]  ;;  %v239_v20 = vld [vmem:[#allocation10 + $0xa0] sm:$0xff]  ;;  %vm300_vm8 = vcmask 7168   ;;  %s681_s23 = smov [#allocation14]   ;;  %s423_s25 = sshll.u32 %s817_s11, 4  ;;  %s424_s25 = int_to_ptr.hbm [resolvable:$true] %s423_s25 }
  0x22   :  { %277 = vmatpush.msra.mxu2 %v242_v19  ;;  %v240_v21 = vld [vmem:[#allocation10 + $0xa8] sm:$0xff]  ;;  %v237_v22 = vld [vmem:[#allocation10 + $0x90] sm:$0xff]  ;;  %v238_v23 = vld [vmem:[#allocation10 + $0x98] sm:$0xff]  ;;  %s421_s24 = sshll.u32 %s681_s23, 4  ;;  %s422_s24 = int_to_ptr.vmem [resolvable:$true] %s421_s24 }
  0x23   :  { %209 = vmatpush.msra.mxu1 %v187_v15  ;;  %v235_v26 = vld [vmem:[#allocation10 + $0x80] sm:$0xff]  ;;  %v236_v27 = vld [vmem:[#allocation10 + $0x88] sm:$0xff]  ;;  %v233_v29 = vld [vmem:[#allocation10 + $0x70] sm:$0xff] }
  0x24   :  { %278 = vmatpush.msra.mxu2 %v240_v21  ;;  %v234_v30 = vld [vmem:[#allocation10 + $0x78] sm:$0xff]  ;;  %v231_v31 = vld [vmem:[#allocation10 + $0x60] sm:$0xff]  ;;  %v232_v32 = vld [vmem:[#allocation10 + $0x68] sm:$0xff] }
  0x25   :  { %210 = vmatpush.msra.mxu1 %v186_v16  ;;  %v229_v33 = vld [vmem:[#allocation10 + $0x50] sm:$0xff]  ;;  %v230_v34 = vld [vmem:[#allocation10 + $0x58] sm:$0xff]  ;;  %v227_v35 = vld [vmem:[#allocation10 + $0x40] sm:$0xff] }
  0x26   :  { %v464_v3 = vpop.eup %463  ;;  %279 = vmatpush.msra.mxu2 %v238_v23  ;;  %v228_v36 = vld [vmem:[#allocation10 + $0x48] sm:$0xff]  ;;  %v225_v38 = vld [vmem:[#allocation10 + $0x30] sm:$0xff]  ;;  %v226_v39 = vld [vmem:[#allocation10 + $0x38] sm:$0xff] }
  0x27   :  { %v150_v4 = vmul.f32 32.0, %v464_v3  ;;  %vm154_vm1 = vweird.f32 %v464_v3  ;;  %211 = vmatpush.msra.mxu1 %v185_v17  ;;  %v458_v45 = vld [vmem:[#allocation5] ss:$0 sm:$0xff]  ;;  %v459_v48 = vld [vmem:[%s808_s2] ss:$0 sm:$0xff]  ;;  %v223_v51 = vld [vmem:[#allocation10 + $0x20] sm:$0xff] }
  0x28   :  { %280 = vmatpush.msra.mxu2 %v236_v27  ;;  %v224_v52 = vld [vmem:[#allocation10 + $0x28] sm:$0xff]  ;;  %v221_v53 = vld [vmem:[#allocation10 + $0x10] sm:$0xff]  ;;  %v222_v54 = vld [vmem:[#allocation10 + $0x18] sm:$0xff] }
  0x29   :  { %v151_v5 = vsub.f32 1.0, %v150_v4  ;;  %257 = vmatpush.msrb.mxu1 %v241_v18  ;;  %v219_v55 = vld [vmem:[#allocation10] sm:$0xff]  ;;  %v220_v56 = vld [vmem:[#allocation10 + $0x8] sm:$0xff]  ;;  %v317_v57 = vld [vmem:[#allocation11 + $0x78] sm:$0xff] }
  0x2a   :  { %281 = vmatpush.msra.mxu2 %v234_v30  ;;  %v316_v58 = vld [vmem:[#allocation11 + $0x70] sm:$0xff]  ;;  %333 = vmatpush.msra.mxu3 %v317_v57  ;;  %v315_v59 = vld [vmem:[#allocation11 + $0x68] sm:$0xff]  ;;  %v314_v60 = vld [vmem:[#allocation11 + $0x60] sm:$0xff] }
  0x2b   :  { %v152_v6 = vmul.f32 %v464_v3, %v151_v5  ;;  %258 = vmatpush.msrb.mxu1 %v239_v20  ;;  %v325_v61 = vld [vmem:[#allocation11 + $0xb8] sm:$0xff]  ;;  %v324_v62 = vld [vmem:[#allocation11 + $0xb0] sm:$0xff]  ;;  %v311_v2 = vld [vmem:[#allocation11 + $0x48] sm:$0xff] }
  0x2c   :  { %282 = vmatpush.msra.mxu2 %v232_v32  ;;  %334 = vmatpush.msra.mxu3 %v316_v58  ;;  %v313_v63 = vld [vmem:[#allocation11 + $0x58] sm:$0xff]  ;;  %v312_v1 = vld [vmem:[#allocation11 + $0x50] sm:$0xff]  ;;  %v303_v15 = vld [vmem:[#allocation11 + $0x8] sm:$0xff] }
  0x2d   :  { %v153_v7 = vadd.f32 %v464_v3, %v152_v6  ;;  %259 = vmatpush.msrb.mxu1 %v237_v22  ;;  %361 = vmatpush.msra.mxu0 %v325_v61  ;;  %v309_v4 = vld [vmem:[#allocation11 + $0x38] sm:$0xff]  ;;  %v308_v5 = vld [vmem:[#allocation11 + $0x30] sm:$0xff]  ;;  %v307_v6 = vld [vmem:[#allocation11 + $0x28] sm:$0xff] }
  0x2e   :  { %283 = vmatpush.msra.mxu2 %v230_v34  ;;  %335 = vmatpush.msra.mxu3 %v315_v59  ;;  %v322_v16 = vld [vmem:[#allocation11 + $0xa0] sm:$0xff]  ;;  %v321_v18 = vld [vmem:[#allocation11 + $0x98] sm:$0xff]  ;;  %v320_v19 = vld [vmem:[#allocation11 + $0x90] sm:$0xff] }
  0x2f   :  { %v155_v8 = vsel %vm154_vm1, %v464_v3, %v153_v7  ;;  %260 = vmatpush.msrb.mxu1 %v235_v26  ;;  %362 = vmatpush.msra.mxu0 %v324_v62  ;;  %v310_v3 = vld [vmem:[#allocation11 + $0x40] sm:$0xff]  ;;  %v319_v20 = vld [vmem:[#allocation11 + $0x88] sm:$0xff]  ;;  %v387_v22 = vld [vmem:[#allocation13 + $0x58] sm:$0xff] }
  0x30   :  { %284 = vmatpush.msra.mxu2 %v228_v36  ;;  %336 = vmatpush.msra.mxu3 %v314_v60  ;;  %v306_v7 = vld [vmem:[#allocation11 + $0x20] sm:$0xff]  ;;  %v386_v23 = vld [vmem:[#allocation13 + $0x50] sm:$0xff]  ;;  %v383_v26 = vld [vmem:[#allocation13 + $0x38] sm:$0xff] }
  0x31   :  { %261 = vmatpush.msrb.mxu1 %v233_v29  ;;  %v302_v17 = vld [vmem:[#allocation11] sm:$0xff]  ;;  %v382_v27 = vld [vmem:[#allocation13 + $0x30] sm:$0xff] }
  0x32   :  { %285 = vmatpush.msra.mxu2 %v226_v39  ;;  %337 = vmatpush.msra.mxu3 %v313_v63  ;;  %v318_v21 = vld [vmem:[#allocation11 + $0x80] sm:$0xff]  ;;  %v381_v39 = vld [vmem:[#allocation13 + $0x28] sm:$0xff] }
  0x33   :  { %262 = vmatpush.msrb.mxu1 %v231_v31 }
  0x34   :  { %286 = vmatpush.msra.mxu2 %v224_v52  ;;  %338 = vmatpush.msra.mxu3 %v312_v1 }
  0x35   :  { %263 = vmatpush.msrb.mxu1 %v229_v33 }
  0x36   :  { %287 = vmatpush.msra.mxu2 %v222_v54  ;;  %339 = vmatpush.msra.mxu3 %v311_v2 }
  0x37   :  { %264 = vmatpush.msrb.mxu1 %v227_v35 }
  0x38   :  { %288 = vmatpush.msra.mxu2 %v220_v56  ;;  %340 = vmatpush.msra.mxu3 %v310_v3 }
  0x39   :  { %265 = vmatpush.msrb.mxu1 %v225_v38 }
  0x3a   :  { %341 = vmatpush.msra.mxu3 %v309_v4 }
  0x3b   :  { %266 = vmatpush.msrb.mxu1 %v223_v51 }
  0x3c   :  { %342 = vmatpush.msra.mxu3 %v308_v5 }
  0x3d   :  { %267 = vmatpush.msrb.mxu1 %v221_v53  ;;  %v462_v53 = vld [vmem:[%s816_s10] ss:$0 sm:$0xff] }
  0x3e   :  { %343 = vmatpush.msra.mxu3 %v307_v6 }
  0x3f   :  { %268 = vmatpush.msrb.mxu1 %v219_v55 }
  0x40   :  { %344 = vmatpush.msra.mxu3 %v306_v7 }
  0x94   :  { %v148_v9 = vpop.xlane.xlu0 %147 }
  0x95   :  { %v156_v10 = vmul.f32 %v155_v8, %v148_v9  ;;  %v460_v9 = vld [vmem:[#allocation8] ss:$0 sm:$0xff] }
  0x97   :  { %v778_v11 = vsub.f32 %v144_v0, %v156_v10  ;;  %v323_v0 = vld [vmem:[#allocation11 + $0xa8] sm:$0xff]  ;;  %v304_v10 = vld [vmem:[#allocation11 + $0x10] sm:$0xff] }
  0x98   :  { %363 = vmatpush.msra.mxu0 %v323_v0 }
  0x99   :  { %v158_v12 = vmul.f32 %v778_v11, %v778_v11 }
  0x9a   :  { %364 = vmatpush.msra.mxu0 %v322_v16 }
  0x9b   :  { %v159_v13 = vsel %vm145_vm0, %v158_v12, 0.0 }
  0x9c   :  { %160 = vadd.xlane.f32.xlu0 %v159_v13  ;;  %365 = vmatpush.msra.mxu0 %v321_v18 }
  0x9e   :  { %366 = vmatpush.msra.mxu0 %v320_v19 }
  0xa0   :  { %367 = vmatpush.msra.mxu0 %v319_v20 }
  0xa2   :  { %368 = vmatpush.msra.mxu0 %v318_v21 }
  0xa4   :  { %399 = vmatpush.msrb.mxu0 %v387_v22 }
  0xa6   :  { %400 = vmatpush.msrb.mxu0 %v386_v23 }
 0x10f   :  { %v161_v24 = vpop.xlane.xlu0 %160 }
 0x110   :  { %v162_v25 = vmul.f32 %v161_v24, %v155_v8  ;;  %v305_v8 = vld [vmem:[#allocation11 + $0x18] sm:$0xff]  ;;  %v385_v24 = vld [vmem:[#allocation13 + $0x48] sm:$0xff] }
 0x111   :  { %345 = vmatpush.msra.mxu3 %v305_v8  ;;  %401 = vmatpush.msrb.mxu0 %v385_v24 }
 0x112   :  { %v163_v28 = vadd.f32 1e-05, %v162_v25  ;;  %v384_v25 = vld [vmem:[#allocation13 + $0x40] sm:$0xff] }
 0x113   :  { %346 = vmatpush.msra.mxu3 %v304_v10  ;;  %402 = vmatpush.msrb.mxu0 %v384_v25 }
 0x114   :  { %465 = vrsqrt.f32 %v163_v28  ;;  %vm170_vm3 = vweird.f32 %v163_v28 }
 0x115   :  { %347 = vmatpush.msra.mxu3 %v303_v15  ;;  %403 = vmatpush.msrb.mxu0 %v383_v26 }
 0x117   :  { %348 = vmatpush.msra.mxu3 %v302_v17  ;;  %404 = vmatpush.msrb.mxu0 %v382_v27 }
 0x119   :  { %405 = vmatpush.msrb.mxu0 %v381_v39 }
 0x11a   :  { %v466_v37 = vpop.eup %465 }
 0x11b   :  { %v165_v40 = vmul.f32 %v466_v37, %v163_v28  ;;  %vm171_vm2 = vweird.f32 %v466_v37  ;;  %v243_v28 = vld [vmem:[%s812_s6] sm:$0x3] }
 0x11c   :  { %vm172_vm4 = vmor %vm170_vm3, %vm171_vm2  ;;  %v245_v29 = vperm.slane %v243_v28, 0  ;;  %v246_v32 = vperm.slane %v243_v28, 1 }
 0x11d   :  { %v166_v41 = vmul.f32 %v466_v37, %v165_v40  ;;  %v380_v40 = vld [vmem:[#allocation13 + $0x20] sm:$0xff] }
 0x11e   :  { %406 = vmatpush.msrb.mxu0 %v380_v40 }
 0x11f   :  { %v167_v42 = vmul.f32 0.5, %v166_v41  ;;  %v379_v41 = vld [vmem:[#allocation13 + $0x18] sm:$0xff] }
 0x120   :  { %407 = vmatpush.msrb.mxu0 %v379_v41 }
 0x121   :  { %v168_v43 = vsub.f32 1.5, %v167_v42  ;;  %v378_v42 = vld [vmem:[#allocation13 + $0x10] sm:$0xff] }
 0x122   :  { %408 = vmatpush.msrb.mxu0 %v378_v42 }
 0x123   :  { %v169_v44 = vmul.f32 %v466_v37, %v168_v43  ;;  %v377_v43 = vld [vmem:[#allocation13 + $0x8] sm:$0xff] }
 0x124   :  { %409 = vmatpush.msrb.mxu0 %v377_v43 }
 0x125   :  { %v173_v46 = vsel %vm172_vm4, %v466_v37, %v169_v44  ;;  %v376_v44 = vld [vmem:[#allocation13] sm:$0xff] }
 0x126   :  { %v174_v47 = vmul.f32 %v173_v46, %v778_v11  ;;  %410 = vmatpush.msrb.mxu0 %v376_v44  ;;  %v461_v46 = vld [vmem:[%s814_s8] ss:$0 sm:$0xff] }
 0x128   :  { %v179_v49 = vmul.f32 %v458_v45, %v174_v47 }
 0x12a   :  { %v184_v50 = vadd.f32 %v459_v48, %v179_v49 }
 0x12c   :  { %440 = vmatmul.msk.f32.vlgmr.msra.gmra.mxu1 %vm145_vm0, %v184_v50 }
 0x1a9   :  { %v213_v11 = vpop.f32.mrf.mxu1 }
 0x1aa   :  { %v214_v12 = vadd.f32 %v460_v9, %v213_v11 }
 0x1ac   :  { %vm216_vm5 = vcmp.gt.f32.partialorder %v214_v12, 0.0  ;;  %v217_v13 = vmul.f32 0.1, %v214_v12 }
 0x1ae   :  { %v218_v14 = vsel %vm216_vm5, %v214_v12, %v217_v13 }
 0x1af   :  { %441 = vmatmul.msk.f32.vlgmr.msrb.gmra.mxu1 %vm249_vm6, %v218_v14  ;;  %442 = vmatmul.msk.f32.vlgmr.msra.gmra.mxu2 %vm249_vm6, %v218_v14 }
 0x22c   :  { %v270_v30 = vpop.f32.mrf.mxu1 }
 0x22d   :  { %v271_v31 = vadd.f32 %v270_v30, %v245_v29 }
 0x22f   :  { %349 = vmatmul.f32.vlgmr.msra.gmra.mxu3 %v271_v31  ;;  %v293_v36 = vand.u32 2147483647, %v271_v31 }
 0x232   :  { %v290_v33 = vpop.f32.mrf.mxu2 }
 0x233   :  { %v291_v34 = vadd.f32 %v290_v33, %v246_v32 }
 0x235   :  { %v294_v35 = vand.u32 2147483647, %v291_v34  ;;  %443 = vmatmul.msk.f32.vlgmr.msra.gmra.mxu0 %vm295_vm7, %v291_v34 }
 0x237   :  { %v296_v37 = vsel %vm295_vm7, %v294_v35, 0.0 }
 0x238   :  { %v297_v38 = vadd.f32 %v296_v37, %v293_v36 }
 0x23a   :  { %298 = vadd.xlane.f32.xlu1 %v297_v38 }
 0x2ad   :  { %v299_v45 = vpop.xlane.xlu1 %298 }
 0x2ae   :  { %301 = vst.msk [vmem:[%s818_s12] sm:$0xff] %vm300_vm8, %v299_v45 }
 0x2b2   :  { %v350_v47 = vpop.f32.mrf.mxu3  ;;  %v370_v49 = vpop.f32.mrf.mxu0 }
 0x2b3   :  { %v351_v48 = vadd.f32 %v461_v46, %v350_v47 }
 0x2b5   :  { %v371_v50 = vadd.f32 %v370_v49, %v351_v48 }
 0x2b7   :  { %vm373_vm9 = vcmp.gt.f32.partialorder %v371_v50, 0.0  ;;  %v374_v51 = vmul.f32 0.1, %v371_v50 }
 0x2b9   :  { %v375_v52 = vsel %vm373_vm9, %v371_v50, %v374_v51 }
 0x2ba   :  { %444 = vmatmul.msk.f32.vlgmr.msrb.gmra.mxu0 %vm249_vm6, %v375_v52 }
 0x337   :  { %v412_v54 = vpop.f32.mrf.mxu0 }
 0x338   :  { %v413_v55 = vadd.f32 %v462_v53, %v412_v54 }
 0x33a   :  { %415 = vst [vmem:[#allocation14] sm:$0xff] %v413_v55 }
 0x33b   :  { %426 = dma.vmem_to_hbm [thread:$0]  %s422_s24, 128, %s424_s25, [#allocation4]  }
 0x33c   :  { %667 = dma.done.wait [#allocation4], 128  }
 0x33d   :  { %668 = vsyncadd [#allocation4], 4294967168 }
 0x33e   :  { %435 = vsyncpa [#allocation3], 1 }
 0x33f   :  { %436 = vsyncpa [#allocation6], 1 }
 0x340   :  { %437 = vsyncpa [#allocation9], 1 }
 0x341   :  { %438 = vsyncpa [#allocation12], 1 }
 0x342   :  { %439 = vsyncpa [#allocation4], 1 }

</bundles_post_ra>
